<compile_context>
chip_gen: v7x
topology: tpu7x:2x2x1
jax: 0.10.0
libtpu: 0.0.40
codegen_flags: <defaults>
</compile_context>

<pallas_src>
import functools

import jax
import jax.numpy as jnp
from jax.experimental import pallas as pl
from jax.experimental.pallas import tpu as pltpu

LN_EPS = 1e-5  # nn.LayerNorm default


def _round_up(n, m):
    return ((n + m - 1) // m) * m


def _layernorm_padded(h, gamma, beta, n_valid):
    # Padded (lane) columns of `h` are exactly zero by construction, so
    # full-width sums equal sums over the valid columns; divide by the true
    # feature count.  var = E[x^2] - E[x]^2 keeps padded zero columns from
    # polluting the centered second moment.  gamma/beta are zero-padded, so
    # padded lanes stay exactly 0 after the affine.
    inv_n = 1.0 / float(n_valid)
    mu = jnp.sum(h, axis=-1, keepdims=True) * inv_n
    ex2 = jnp.sum(h * h, axis=-1, keepdims=True) * inv_n
    var = jnp.maximum(ex2 - mu * mu, 0.0)
    inv = jax.lax.rsqrt(var + LN_EPS)
    return (h - mu) * inv * gamma + beta


def _mlp_kernel(
    x_ref,
    w1_ref, b1_ref, g1_ref, be1_ref,
    w2_ref, b2_ref, g2_ref, be2_ref,
    w3_ref, b3_ref,
    o_ref,
    *, hidden_valid,
):
    cdt = w1_ref.dtype  # matmul compute dtype (bf16 by default, f32 optional)

    # ---- layer 1: Linear -> LayerNorm -> ReLU (Dropout = identity in eval) ----
    # TODO(synk): Dropout(p=0.1) is training-only stochastic masking; kernel
    # implements inference semantics (identity).
    x = x_ref[...]
    h = jnp.dot(x.astype(cdt), w1_ref[...], preferred_element_type=jnp.float32)
    h = h + b1_ref[...]
    h = jnp.maximum(_layernorm_padded(h, g1_ref[...], be1_ref[...], hidden_valid), 0.0)

    # ---- layer 2: Linear -> LayerNorm -> ReLU ----
    h = jnp.dot(h.astype(cdt), w2_ref[...], preferred_element_type=jnp.float32)
    h = h + b2_ref[...]
    h = jnp.maximum(_layernorm_padded(h, g2_ref[...], be2_ref[...], hidden_valid), 0.0)

    # ---- output projection ----
    y = jnp.dot(h.astype(cdt), w3_ref[...], preferred_element_type=jnp.float32)
    y = y + b3_ref[...]
    o_ref[...] = y.astype(o_ref.dtype)


def prepare_params(params, compute_dtype=jnp.bfloat16):
    """One-time parameter prep (hoisted out of the per-call wrapper):
    transpose weights to [in, out], zero-pad lane dims to multiples of 128,
    cast matmul operands to `compute_dtype`, reshape 1-D params to [1, D]."""
    in_dim = int(params["w1"].shape[1])
    hidden = int(params["w1"].shape[0])
    out_dim = int(params["w3"].shape[0])
    in_pad = _round_up(in_dim, 128)
    h_pad = _round_up(hidden, 128)
    out_pad = _round_up(out_dim, 128)

    def pad_w(w_t, rows, cols):  # w_t already [in, out]
        return jnp.pad(
            w_t, ((0, rows - w_t.shape[0]), (0, cols - w_t.shape[1]))
        ).astype(compute_dtype)

    def pad_v(v, n):
        return jnp.pad(v, (0, n - v.shape[0])).astype(jnp.float32)[None, :]

    return {
        "w1": pad_w(params["w1"].T, in_pad, h_pad),
        "b1": pad_v(params["b1"], h_pad),
        "g1": pad_v(params["g1"], h_pad),   # padded gamma entries are 0 (not 1)
        "be1": pad_v(params["be1"], h_pad),
        "w2": pad_w(params["w2"].T, h_pad, h_pad),
        "b2": pad_v(params["b2"], h_pad),
        "g2": pad_v(params["g2"], h_pad),
        "be2": pad_v(params["be2"], h_pad),
        "w3": pad_w(params["w3"].T, h_pad, out_pad),
        "b3": pad_v(params["b3"], out_pad),
        "_dims": (in_dim, hidden, out_dim, in_pad, h_pad, out_pad),
    }


def hpcr_prediction_head_forward(x, prepped, *, tile_b_max=512):
    """x: [B, input_dim]; prepped: output of prepare_params()."""
    in_dim, hidden, out_dim, in_pad, h_pad, out_pad = prepped["_dims"]
    B = x.shape[0]

    # Batch tile: multiple of 8 (f32 sublane), capped by tile_b_max.
    tile_b = min(int(tile_b_max), _round_up(max(B, 1), 8))
    tile_b = _round_up(tile_b, 8)
    b_pad = _round_up(B, tile_b)

    x_p = x
    if (b_pad, in_pad) != x.shape:
        x_p = jnp.pad(x, ((0, b_pad - B), (0, in_pad - in_dim)))

    args = (
        x_p,
        prepped["w1"], prepped["b1"], prepped["g1"], prepped["be1"],
        prepped["w2"], prepped["b2"], prepped["g2"], prepped["be2"],
        prepped["w3"], prepped["b3"],
    )

    def resident(a):
        # Full-array block with constant index_map -> no re-DMA per grid step.
        nd = a.ndim
        return pl.BlockSpec(a.shape, lambda i, _nd=nd: (0,) * _nd)

    in_specs = [pl.BlockSpec((tile_b, in_pad), lambda i: (i, 0))]
    in_specs += [resident(a) for a in args[1:]]
    out_specs = pl.BlockSpec((tile_b, out_pad), lambda i: (i, 0))

    # VMEM budget: resident weights/params + double-buffered x/out tiles +
    # intermediate [tile_b, h_pad] activations, ~50% headroom.
    def nbytes(a):
        return a.size * a.dtype.itemsize

    weight_bytes = sum(nbytes(prepped[k]) for k in ("w1", "w2", "w3"))
    small_bytes = sum(nbytes(prepped[k])
                      for k in ("b1", "g1", "be1", "b2", "g2", "be2", "b3"))
    io_bytes = 2 * tile_b * (in_pad + out_pad) * x.dtype.itemsize
    act_bytes = 4 * tile_b * max(h_pad, out_pad) * 4
    vmem_limit = int(1.5 * (weight_bytes + small_bytes + io_bytes + act_bytes))
    vmem_limit = min(max(vmem_limit, 4 * 1024 * 1024), 100 * 1024 * 1024)

    kernel = functools.partial(_mlp_kernel, hidden_valid=hidden)

    y_pad = pl.pallas_call(
        kernel,
        out_shape=jax.ShapeDtypeStruct((b_pad, out_pad), x.dtype),
        grid=(b_pad // tile_b,),
        in_specs=in_specs,
        out_specs=out_specs,
        compiler_params=pltpu.CompilerParams(
            dimension_semantics=("parallel",),  # megacore sharding on v7x
            vmem_limit_bytes=vmem_limit,
        ),
    )(*args)
    return y_pad[:B, :out_dim]


def _xavier_uniform(key, shape):
    # shape = (fan_out, fan_in), matching nn.Linear.weight
    fan_out, fan_in = shape
    limit = (6.0 / (fan_in + fan_out)) ** 0.5
    return jax.random.uniform(key, shape, jnp.float32, -limit, limit)


def init_params(key, input_dim, hidden_dim, output_dim):
    k1, k2, k3 = jax.random.split(key, 3)
    return {
        "w1": _xavier_uniform(k1, (hidden_dim, input_dim)),
        "b1": jnp.zeros((hidden_dim,), jnp.float32),
        "g1": jnp.ones((hidden_dim,), jnp.float32),
        "be1": jnp.zeros((hidden_dim,), jnp.float32),
        "w2": _xavier_uniform(k2, (hidden_dim, hidden_dim)),
        "b2": jnp.zeros((hidden_dim,), jnp.float32),
        "g2": jnp.ones((hidden_dim,), jnp.float32),
        "be2": jnp.zeros((hidden_dim,), jnp.float32),
        "w3": _xavier_uniform(k3, (output_dim, hidden_dim)),
        "b3": jnp.zeros((output_dim,), jnp.float32),
    }


def _reference_forward(x, p):
    def ln(h, g, b):
        mu = jnp.mean(h, axis=-1, keepdims=True)
        var = jnp.mean((h - mu) ** 2, axis=-1, keepdims=True)
        return (h - mu) / jnp.sqrt(var + LN_EPS) * g + b

    h = jnp.maximum(ln(x @ p["w1"].T + p["b1"], p["g1"], p["be1"]), 0.0)
    h = jnp.maximum(ln(h @ p["w2"].T + p["b2"], p["g2"], p["be2"]), 0.0)
    return h @ p["w3"].T + p["b3"]


if __name__ == "__main__":
    # Small shapes consistent with the module defaults (num_layers=2):
    # batch=24, input_dim=16, hidden_dim=32, output_dim=8.
    B, IN_DIM, HIDDEN, OUT_DIM = 24, 16, 32, 8

    key = jax.random.PRNGKey(0)
    kx, kp = jax.random.split(key)
    x = jax.random.normal(kx, (B, IN_DIM), jnp.float32)
    params = init_params(kp, IN_DIM, HIDDEN, OUT_DIM)

    y_ref = _reference_forward(x, params)

    # f32 compute path: strict check of kernel structure (LN / ReLU / padding).
    y_f32 = jax.block_until_ready(
        hpcr_prediction_head_forward(x, prepare_params(params, jnp.float32)))
    assert y_f32.shape == (B, OUT_DIM)
    assert jnp.allclose(y_f32, y_ref, atol=1e-3, rtol=1e-3), "f32 path mismatch"

    # bf16-weight path (performance default): looser tolerance for bf16 matmul
    # quantization with f32 accumulation.
    prepped = prepare_params(params, jnp.bfloat16)
    y_bf = jax.block_until_ready(hpcr_prediction_head_forward(x, prepped))
    assert y_bf.shape == (B, OUT_DIM)
    assert jnp.allclose(y_bf, y_ref, atol=7e-2, rtol=7e-2), "bf16 path mismatch"

    # Exercise a multi-step pipelined batch grid (3 tiles of 8 rows).
    y_grid = jax.block_until_ready(
        hpcr_prediction_head_forward(x, prepped, tile_b_max=8))
    assert jnp.allclose(y_grid, y_ref, atol=7e-2, rtol=7e-2), "grid path mismatch"

    print("KERNEL_OK")
</pallas_src>

<mosaic_0001>
module attributes {stable_mosaic.version = 11 : i64} {
  func.func @_mlp_kernel(%arg0: i32, %arg1: memref<24x128xf32, #tpu.memory_space<vmem>>, %arg2: memref<128x128xf32, #tpu.memory_space<vmem>>, %arg3: memref<1x128xf32, #tpu.memory_space<vmem>>, %arg4: memref<1x128xf32, #tpu.memory_space<vmem>>, %arg5: memref<1x128xf32, #tpu.memory_space<vmem>>, %arg6: memref<128x128xf32, #tpu.memory_space<vmem>>, %arg7: memref<1x128xf32, #tpu.memory_space<vmem>>, %arg8: memref<1x128xf32, #tpu.memory_space<vmem>>, %arg9: memref<1x128xf32, #tpu.memory_space<vmem>>, %arg10: memref<128x128xf32, #tpu.memory_space<vmem>>, %arg11: memref<1x128xf32, #tpu.memory_space<vmem>>, %arg12: memref<24x128xf32, #tpu.memory_space<vmem>>) attributes {dimension_semantics = [#tpu.dimension_semantics<parallel>], iteration_bounds = array<i64: 1>, scalar_prefetch = 0 : i64, scratch_operands = 0 : i64, tpu.core_type = #tpu.core_type<tc>, window_params = [{transform_indices = @transform_0, window_bounds = array<i64: 24, 128>}, {pipeline_mode = #tpu.pipeline_mode<synchronous>, transform_indices = @transform_1, window_bounds = array<i64: 128, 128>}, {pipeline_mode = #tpu.pipeline_mode<synchronous>, transform_indices = @transform_2, window_bounds = array<i64: 1, 128>}, {pipeline_mode = #tpu.pipeline_mode<synchronous>, transform_indices = @transform_3, window_bounds = array<i64: 1, 128>}, {pipeline_mode = #tpu.pipeline_mode<synchronous>, transform_indices = @transform_4, window_bounds = array<i64: 1, 128>}, {pipeline_mode = #tpu.pipeline_mode<synchronous>, transform_indices = @transform_5, window_bounds = array<i64: 128, 128>}, {pipeline_mode = #tpu.pipeline_mode<synchronous>, transform_indices = @transform_6, window_bounds = array<i64: 1, 128>}, {pipeline_mode = #tpu.pipeline_mode<synchronous>, transform_indices = @transform_7, window_bounds = array<i64: 1, 128>}, {pipeline_mode = #tpu.pipeline_mode<synchronous>, transform_indices = @transform_8, window_bounds = array<i64: 1, 128>}, {pipeline_mode = #tpu.pipeline_mode<synchronous>, transform_indices = @transform_9, window_bounds = array<i64: 128, 128>}, {pipeline_mode = #tpu.pipeline_mode<synchronous>, transform_indices = @transform_10, window_bounds = array<i64: 1, 128>}, {transform_indices = @transform_11, window_bounds = array<i64: 24, 128>}]} {
    %c0 = arith.constant 0 : index
    %c0_0 = arith.constant 0 : index
    %0 = vector.load %arg1[%c0, %c0_0] : memref<24x128xf32, #tpu.memory_space<vmem>>, vector<24x128xf32>
    %c0_1 = arith.constant 0 : index
    %c0_2 = arith.constant 0 : index
    %1 = vector.load %arg2[%c0_1, %c0_2] : memref<128x128xf32, #tpu.memory_space<vmem>>, vector<128x128xf32>
    %cst = arith.constant dense<0.000000e+00> : vector<24x128xf32>
    %2 = tpu.matmul %0, %1, %cst {dimension_numbers = #tpu.dot_dimension_numbers<[1], [0], [0], [1], [0, 0, 1, 1], [], []>} : vector<24x128xf32>, vector<128x128xf32>, vector<24x128xf32> -> vector<24x128xf32>
    %c0_3 = arith.constant 0 : index
    %c0_4 = arith.constant 0 : index
    %3 = vector.load %arg3[%c0_3, %c0_4] : memref<1x128xf32, #tpu.memory_space<vmem>>, vector<1x128xf32>
    %4 = vector.broadcast %3 : vector<1x128xf32> to vector<24x128xf32>
    %5 = arith.addf %2, %4 : vector<24x128xf32>
    %c0_5 = arith.constant 0 : index
    %c0_6 = arith.constant 0 : index
    %6 = vector.load %arg4[%c0_5, %c0_6] : memref<1x128xf32, #tpu.memory_space<vmem>>, vector<1x128xf32>
    %c0_7 = arith.constant 0 : index
    %c0_8 = arith.constant 0 : index
    %7 = vector.load %arg5[%c0_7, %c0_8] : memref<1x128xf32, #tpu.memory_space<vmem>>, vector<1x128xf32>
    %cst_9 = arith.constant dense<0.000000e+00> : vector<24xf32>
    %8 = vector.multi_reduction <add>, %5, %cst_9 [1] : vector<24x128xf32> to vector<24xf32>
    %9 = vector.shape_cast %8 : vector<24xf32> to vector<24x1xf32>
    %cst_10 = arith.constant 3.125000e-02 : f32
    %10 = vector.broadcast %cst_10 : f32 to vector<24x1xf32>
    %11 = arith.mulf %9, %10 : vector<24x1xf32>
    %12 = arith.mulf %5, %5 : vector<24x128xf32>
    %cst_11 = arith.constant dense<0.000000e+00> : vector<24xf32>
    %13 = vector.multi_reduction <add>, %12, %cst_11 [1] : vector<24x128xf32> to vector<24xf32>
    %14 = vector.shape_cast %13 : vector<24xf32> to vector<24x1xf32>
    %cst_12 = arith.constant 3.125000e-02 : f32
    %15 = vector.broadcast %cst_12 : f32 to vector<24x1xf32>
    %16 = arith.mulf %14, %15 : vector<24x1xf32>
    %17 = arith.mulf %11, %11 : vector<24x1xf32>
    %18 = arith.subf %16, %17 : vector<24x1xf32>
    %cst_13 = arith.constant 0.000000e+00 : f32
    %19 = vector.broadcast %cst_13 : f32 to vector<24x1xf32>
    %20 = arith.maximumf %18, %19 : vector<24x1xf32>
    %cst_14 = arith.constant 9.99999974E-6 : f32
    %21 = vector.broadcast %cst_14 : f32 to vector<24x1xf32>
    %22 = arith.addf %20, %21 : vector<24x1xf32>
    %23 = math.rsqrt %22 : vector<24x1xf32>
    %24 = vector.broadcast %11 : vector<24x1xf32> to vector<24x128xf32>
    %25 = arith.subf %5, %24 : vector<24x128xf32>
    %26 = vector.broadcast %23 : vector<24x1xf32> to vector<24x128xf32>
    %27 = arith.mulf %25, %26 : vector<24x128xf32>
    %28 = vector.broadcast %6 : vector<1x128xf32> to vector<24x128xf32>
    %29 = arith.mulf %27, %28 : vector<24x128xf32>
    %30 = vector.broadcast %7 : vector<1x128xf32> to vector<24x128xf32>
    %31 = arith.addf %29, %30 : vector<24x128xf32>
    %cst_15 = arith.constant 0.000000e+00 : f32
    %32 = vector.broadcast %cst_15 : f32 to vector<24x128xf32>
    %33 = arith.maximumf %31, %32 : vector<24x128xf32>
    %c0_16 = arith.constant 0 : index
    %c0_17 = arith.constant 0 : index
    %34 = vector.load %arg6[%c0_16, %c0_17] : memref<128x128xf32, #tpu.memory_space<vmem>>, vector<128x128xf32>
    %cst_18 = arith.constant dense<0.000000e+00> : vector<24x128xf32>
    %35 = tpu.matmul %33, %34, %cst_18 {dimension_numbers = #tpu.dot_dimension_numbers<[1], [0], [0], [1], [0, 0, 1, 1], [], []>} : vector<24x128xf32>, vector<128x128xf32>, vector<24x128xf32> -> vector<24x128xf32>
    %c0_19 = arith.constant 0 : index
    %c0_20 = arith.constant 0 : index
    %36 = vector.load %arg7[%c0_19, %c0_20] : memref<1x128xf32, #tpu.memory_space<vmem>>, vector<1x128xf32>
    %37 = vector.broadcast %36 : vector<1x128xf32> to vector<24x128xf32>
    %38 = arith.addf %35, %37 : vector<24x128xf32>
    %c0_21 = arith.constant 0 : index
    %c0_22 = arith.constant 0 : index
    %39 = vector.load %arg8[%c0_21, %c0_22] : memref<1x128xf32, #tpu.memory_space<vmem>>, vector<1x128xf32>
    %c0_23 = arith.constant 0 : index
    %c0_24 = arith.constant 0 : index
    %40 = vector.load %arg9[%c0_23, %c0_24] : memref<1x128xf32, #tpu.memory_space<vmem>>, vector<1x128xf32>
    %cst_25 = arith.constant dense<0.000000e+00> : vector<24xf32>
    %41 = vector.multi_reduction <add>, %38, %cst_25 [1] : vector<24x128xf32> to vector<24xf32>
    %42 = vector.shape_cast %41 : vector<24xf32> to vector<24x1xf32>
    %cst_26 = arith.constant 3.125000e-02 : f32
    %43 = vector.broadcast %cst_26 : f32 to vector<24x1xf32>
    %44 = arith.mulf %42, %43 : vector<24x1xf32>
    %45 = arith.mulf %38, %38 : vector<24x128xf32>
    %cst_27 = arith.constant dense<0.000000e+00> : vector<24xf32>
    %46 = vector.multi_reduction <add>, %45, %cst_27 [1] : vector<24x128xf32> to vector<24xf32>
    %47 = vector.shape_cast %46 : vector<24xf32> to vector<24x1xf32>
    %cst_28 = arith.constant 3.125000e-02 : f32
    %48 = vector.broadcast %cst_28 : f32 to vector<24x1xf32>
    %49 = arith.mulf %47, %48 : vector<24x1xf32>
    %50 = arith.mulf %44, %44 : vector<24x1xf32>
    %51 = arith.subf %49, %50 : vector<24x1xf32>
    %cst_29 = arith.constant 0.000000e+00 : f32
    %52 = vector.broadcast %cst_29 : f32 to vector<24x1xf32>
    %53 = arith.maximumf %51, %52 : vector<24x1xf32>
    %cst_30 = arith.constant 9.99999974E-6 : f32
    %54 = vector.broadcast %cst_30 : f32 to vector<24x1xf32>
    %55 = arith.addf %53, %54 : vector<24x1xf32>
    %56 = math.rsqrt %55 : vector<24x1xf32>
    %57 = vector.broadcast %44 : vector<24x1xf32> to vector<24x128xf32>
    %58 = arith.subf %38, %57 : vector<24x128xf32>
    %59 = vector.broadcast %56 : vector<24x1xf32> to vector<24x128xf32>
    %60 = arith.mulf %58, %59 : vector<24x128xf32>
    %61 = vector.broadcast %39 : vector<1x128xf32> to vector<24x128xf32>
    %62 = arith.mulf %60, %61 : vector<24x128xf32>
    %63 = vector.broadcast %40 : vector<1x128xf32> to vector<24x128xf32>
    %64 = arith.addf %62, %63 : vector<24x128xf32>
    %cst_31 = arith.constant 0.000000e+00 : f32
    %65 = vector.broadcast %cst_31 : f32 to vector<24x128xf32>
    %66 = arith.maximumf %64, %65 : vector<24x128xf32>
    %c0_32 = arith.constant 0 : index
    %c0_33 = arith.constant 0 : index
    %67 = vector.load %arg10[%c0_32, %c0_33] : memref<128x128xf32, #tpu.memory_space<vmem>>, vector<128x128xf32>
    %cst_34 = arith.constant dense<0.000000e+00> : vector<24x128xf32>
    %68 = tpu.matmul %66, %67, %cst_34 {dimension_numbers = #tpu.dot_dimension_numbers<[1], [0], [0], [1], [0, 0, 1, 1], [], []>} : vector<24x128xf32>, vector<128x128xf32>, vector<24x128xf32> -> vector<24x128xf32>
    %c0_35 = arith.constant 0 : index
    %c0_36 = arith.constant 0 : index
    %69 = vector.load %arg11[%c0_35, %c0_36] : memref<1x128xf32, #tpu.memory_space<vmem>>, vector<1x128xf32>
    %70 = vector.broadcast %69 : vector<1x128xf32> to vector<24x128xf32>
    %71 = arith.addf %68, %70 : vector<24x128xf32>
    %c0_37 = arith.constant 0 : index
    %c0_38 = arith.constant 0 : index
    %72 = vector.load %arg12[%c0_37, %c0_38] : memref<24x128xf32, #tpu.memory_space<vmem>>, vector<24x128xf32>
    tpu.vector_store %arg12[%c0_37, %c0_38], %71 {strides = array<i32>} : memref<24x128xf32, #tpu.memory_space<vmem>>, vector<24x128xf32>,
    return
  }
  func.func @transform_0(%arg0: i32) -> (i32, i32) {
    %c0_i32 = arith.constant 0 : i32
    %c0_i32_0 = arith.constant 0 : i32
    return %arg0, %c0_i32 : i32, i32
  }
  func.func @transform_1(%arg0: i32) -> (i32, i32) {
    %c0_i32 = arith.constant 0 : i32
    %c0_i32_0 = arith.constant 0 : i32
    %c0_i32_1 = arith.constant 0 : i32
    return %c0_i32, %c0_i32_0 : i32, i32
  }
  func.func @transform_2(%arg0: i32) -> (i32, i32) {
    %c0_i32 = arith.constant 0 : i32
    %c0_i32_0 = arith.constant 0 : i32
    %c0_i32_1 = arith.constant 0 : i32
    return %c0_i32, %c0_i32_0 : i32, i32
  }
  func.func @transform_3(%arg0: i32) -> (i32, i32) {
    %c0_i32 = arith.constant 0 : i32
    %c0_i32_0 = arith.constant 0 : i32
    %c0_i32_1 = arith.constant 0 : i32
    return %c0_i32, %c0_i32_0 : i32, i32
  }
  func.func @transform_4(%arg0: i32) -> (i32, i32) {
    %c0_i32 = arith.constant 0 : i32
    %c0_i32_0 = arith.constant 0 : i32
    %c0_i32_1 = arith.constant 0 : i32
    return %c0_i32, %c0_i32_0 : i32, i32
  }
  func.func @transform_5(%arg0: i32) -> (i32, i32) {
    %c0_i32 = arith.constant 0 : i32
    %c0_i32_0 = arith.constant 0 : i32
    %c0_i32_1 = arith.constant 0 : i32
    return %c0_i32, %c0_i32_0 : i32, i32
  }
  func.func @transform_6(%arg0: i32) -> (i32, i32) {
    %c0_i32 = arith.constant 0 : i32
    %c0_i32_0 = arith.constant 0 : i32
    %c0_i32_1 = arith.constant 0 : i32
    return %c0_i32, %c0_i32_0 : i32, i32
  }
  func.func @transform_7(%arg0: i32) -> (i32, i32) {
    %c0_i32 = arith.constant 0 : i32
    %c0_i32_0 = arith.constant 0 : i32
    %c0_i32_1 = arith.constant 0 : i32
    return %c0_i32, %c0_i32_0 : i32, i32
  }
  func.func @transform_8(%arg0: i32) -> (i32, i32) {
    %c0_i32 = arith.constant 0 : i32
    %c0_i32_0 = arith.constant 0 : i32
    %c0_i32_1 = arith.constant 0 : i32
    return %c0_i32, %c0_i32_0 : i32, i32
  }
  func.func @transform_9(%arg0: i32) -> (i32, i32) {
    %c0_i32 = arith.constant 0 : i32
    %c0_i32_0 = arith.constant 0 : i32
    %c0_i32_1 = arith.constant 0 : i32
    return %c0_i32, %c0_i32_0 : i32, i32
  }
  func.func @transform_10(%arg0: i32) -> (i32, i32) {
    %c0_i32 = arith.constant 0 : i32
    %c0_i32_0 = arith.constant 0 : i32
    %c0_i32_1 = arith.constant 0 : i32
    return %c0_i32, %c0_i32_0 : i32, i32
  }
  func.func @transform_11(%arg0: i32) -> (i32, i32) {
    %c0_i32 = arith.constant 0 : i32
    %c0_i32_0 = arith.constant 0 : i32
    return %arg0, %c0_i32 : i32, i32
  }
}

</mosaic_0001>

<bundles_post_ra>
// kernel: tpu_custom_call.1
= control target key start
LH: loop header
LB: loop body
LE: loop exit
PB: predicated region body
PF: predicated region fallthrough
CT: control target
= control target key end

     0   :  { %16 = vsyncpa [#allocation3], 0  ;;  %s1239_s0 = inlined_call_operand.hbm [shape: f32[24,128], index: 0, kind: input, shape index: {}]   ;;  %s1240_s1 = inlined_call_operand.hbm [shape: f32[128,128], index: 1, kind: input, shape index: {}]   ;;  %s1241_s2 = inlined_call_operand.vmem [shape: f32[1,128], index: 2, kind: input, shape index: {}]   ;;  %s1242_s3 = inlined_call_operand.vmem [shape: f32[1,128], index: 3, kind: input, shape index: {}]   ;;  %s1243_s4 = inlined_call_operand.vmem [shape: f32[1,128], index: 4, kind: input, shape index: {}]   ;;  %s1244_s5 = inlined_call_operand.hbm [shape: f32[128,128], index: 5, kind: input, shape index: {}]   ;;  %s1245_s6 = inlined_call_operand.vmem [shape: f32[1,128], index: 6, kind: input, shape index: {}]   ;;  %s1246_s7 = inlined_call_operand.vmem [shape: f32[1,128], index: 7, kind: input, shape index: {}]   ;;  %s1247_s8 = inlined_call_operand.vmem [shape: f32[1,128], index: 8, kind: input, shape index: {}]   ;;  %s1248_s9 = inlined_call_operand.hbm [shape: f32[128,128], index: 9, kind: input, shape index: {}]   ;;  %s1249_s10 = inlined_call_operand.vmem [shape: f32[1,128], index: 10, kind: input, shape index: {}]   ;;  %s1250_s11 = inlined_call_operand.hbm [shape: f32[24,128], index: 11, kind: output, shape index: {}]  }
   0x1   :  { %17 = vsyncpa [#allocation6], 0 }
   0x2   :  { %18 = vsyncpa [#allocation9], 0 }
   0x3   :  { %19 = vsyncpa [#allocation4], 0  ;;  %s973_s17 = smov [#allocation5]   ;;  %s974_s19 = smov [#allocation2]  }
   0x4   :  { %s37_s18 = sshll.u32 %s973_s17, 4  ;;  %s25_s20 = sshll.u32 %s974_s19, 4  ;;  %s38_s18 = int_to_ptr.vmem [resolvable:$true] %s37_s18  ;;  %s1043_s20 = int_to_ptr.vmem [resolvable:$true] %s25_s20 }
   0x5   :  { %s855_s23 = scalar_lea.hbm %s1240_s1, 2048 }
   0x6   :  { %p856_p0 = scmp.ne.s32.totalorder %s1240_s1, %s855_s23  ;;  %p859_p1 = scmp.lt.u32.totalorder %s855_s23, %s1240_s1 }
   0x8   :  { %p861_p2 = pnand %p859_p1, %p856_p0 }
   0xa   :  { %864 = shalt.err (!%p861_p2)
}
   0xb   :  { %s865_s28 = scalar_lea.vmem %s38_s18, 2048  ;;  %p870_p4 = scmp.lt.s32.totalorder %s38_s18, %s38_s18 }
   0xc   :  { %p866_p3 = scmp.ne.s32.totalorder %s38_s18, %s865_s28  ;;  %p871_p5 = scmp.lt.s32.totalorder %s865_s28, %s865_s28 }
   0xe   :  { %p872_p6 = por %p871_p5, %p870_p4 }
  0x10   :  { %p873_p7 = pnand %p872_p6, %p866_p3 }
  0x12   :  { %876 = shalt.err (!%p873_p7)
}
  0x13   :  { %s975_s29 = smov 128   ;;  %s976_s30 = smov 8  }
  0x14   :  { %43 = dma.hbm_to_vmem [thread:$0]  %s1240_s1, 2048, %s38_s18, [#allocation6], %s975_s29, %s975_s29, %s976_s30  }
  0x15   :  { %s877_s16 = scalar_lea.hbm %s1239_s0, 384 }
  0x16   :  { %p878_p8 = scmp.ne.s32.totalorder %s1239_s0, %s877_s16  ;;  %p881_p9 = scmp.lt.u32.totalorder %s877_s16, %s1239_s0 }
  0x18   :  { %p883_p10 = pnand %p881_p9, %p878_p8 }
  0x1a   :  { %886 = shalt.err (!%p883_p10)
}
  0x1b   :  { %s887_s23 = scalar_lea.vmem %s1043_s20, 384  ;;  %p892_p12 = scmp.lt.s32.totalorder %s1043_s20, %s1043_s20 }
  0x1c   :  { %p888_p11 = scmp.ne.s32.totalorder %s1043_s20, %s887_s23  ;;  %p893_p13 = scmp.lt.s32.totalorder %s887_s23, %s887_s23 }
  0x1e   :  { %p894_p0 = por %p893_p13, %p892_p12 }
  0x20   :  { %p895_p1 = pnand %p894_p0, %p888_p11 }
  0x22   :  { %898 = shalt.err (!%p895_p1)
}
  0x23   :  { %31 = dma.hbm_to_vmem [thread:$0]  %s1239_s0, 384, %s1043_s20, [#allocation3], %s975_s29, %s975_s29, %s976_s30  }
  0x24   :  { %s977_s24 = smov [#allocation7]   ;;  %s978_s26 = smov [#allocation8]  }
  0x25   :  { %s55_s25 = sshll.u32 %s977_s24, 4  ;;  %s73_s27 = sshll.u32 %s978_s26, 4  ;;  %s56_s25 = int_to_ptr.vmem [resolvable:$true] %s55_s25  ;;  %s1080_s27 = int_to_ptr.vmem [resolvable:$true] %s73_s27 }
  0x26   :  { %s899_s13 = scalar_lea.hbm %s1244_s5, 2048 }
  0x27   :  { %p900_p2 = scmp.ne.s32.totalorder %s1244_s5, %s899_s13  ;;  %p903_p3 = scmp.lt.u32.totalorder %s899_s13, %s1244_s5 }
  0x29   :  { %p905_p4 = pnand %p903_p3, %p900_p2 }
  0x2b   :  { %908 = shalt.err (!%p905_p4)
}
  0x2c   :  { %s909_s0 = scalar_lea.vmem %s56_s25, 2048  ;;  %p914_p6 = scmp.lt.s32.totalorder %s56_s25, %s56_s25 }
  0x2d   :  { %p910_p5 = scmp.ne.s32.totalorder %s56_s25, %s909_s0  ;;  %p915_p7 = scmp.lt.s32.totalorder %s909_s0, %s909_s0 }
  0x2f   :  { %p916_p8 = por %p915_p7, %p914_p6 }
  0x31   :  { %p917_p9 = pnand %p916_p8, %p910_p5 }
  0x33   :  { %920 = shalt.err (!%p917_p9)
}
  0x34   :  { %61 = dma.hbm_to_vmem [thread:$0]  %s1244_s5, 2048, %s56_s25, [#allocation6], %s975_s29, %s975_s29, %s976_s30  }
  0x35   :  { %s921_s23 = scalar_lea.hbm %s1248_s9, 2048 }
  0x36   :  { %p922_p10 = scmp.ne.s32.totalorder %s1248_s9, %s921_s23  ;;  %p925_p11 = scmp.lt.u32.totalorder %s921_s23, %s1248_s9 }
  0x38   :  { %p927_p12 = pnand %p925_p11, %p922_p10 }
  0x3a   :  { %930 = shalt.err (!%p927_p12)
}
  0x3b   :  { %s931_s28 = scalar_lea.vmem %s1080_s27, 2048  ;;  %p936_p0 = scmp.lt.s32.totalorder %s1080_s27, %s1080_s27 }
  0x3c   :  { %p932_p13 = scmp.ne.s32.totalorder %s1080_s27, %s931_s28  ;;  %p937_p1 = scmp.lt.s32.totalorder %s931_s28, %s931_s28 }
  0x3e   :  { %p938_p2 = por %p937_p1, %p936_p0 }
  0x40   :  { %p939_p3 = pnand %p938_p2, %p932_p13 }
  0x42   :  { %942 = shalt.err (!%p939_p3)
}
  0x43   :  { %79 = dma.hbm_to_vmem [thread:$0]  %s1248_s9, 2048, %s1080_s27, [#allocation9], %s975_s29, %s975_s29, %s976_s30  }
  0x44   :  { %965 = dma.done.wait [#allocation3], 384  }
  0x45   :  { %966 = vsyncadd [#allocation3], 4294966912 }
  0x46   :  { %967 = dma.done.wait [#allocation6], 4096  }
  0x47   :  { %968 = vsyncadd [#allocation6], 4294963200 }
  0x48   :  { %969 = dma.done.wait [#allocation9], 2048  }
  0x49   :  { %970 = vsyncadd [#allocation9], 4294965248  ;;  %v979_v0 = vmov 0.0|0.0   ;;  %vm980_vm0 = vmmov 0   ;;  %v981_v1 = vmov 0.0   ;;  %v97_v2 = vld [vmem:[#allocation5] sm:$0xff] }
  0x4a   :  { %745 = vmatprep.subr.bf16.mxu0 %v979_v0  ;;  %654 = vmatprep.mubr.msk.f32.mxu0 %vm980_vm0, %v981_v1  ;;  %v98_v3 = vld [vmem:[#allocation5 + $0x8] sm:$0xff]  ;;  %v99_v4 = vld [vmem:[#allocation5 + $0x10] sm:$0xff]  ;;  %v100_v6 = vld [vmem:[#allocation5 + $0x18] sm:$0xff]  ;;  %s982_s0 = smov [#allocation10]  }
  0x4b   :  { %769 = vmatprep.subr.bf16.mxu1 %v979_v0  ;;  %695 = vmatprep.mubr.msk.f32.mxu1 %vm980_vm0, %v981_v1  ;;  %v746_v5 = vpack.c.bf16 %v98_v3, %v97_v2  ;;  %v749_v7 = vpack.c.bf16 %v100_v6, %v99_v4  ;;  %v101_v8 = vld [vmem:[#allocation5 + $0x20] sm:$0xff]  ;;  %v102_v9 = vld [vmem:[#allocation5 + $0x28] sm:$0xff]  ;;  %v103_v11 = vld [vmem:[#allocation5 + $0x30] sm:$0xff]  ;;  %s544_s20 = sshll.u32 %s982_s0, 4  ;;  %s545_s20 = int_to_ptr.vmem [resolvable:$true] %s544_s20 }
  0x4c   :  { %v752_v10 = vpack.c.bf16 %v102_v9, %v101_v8  ;;  %v104_v12 = vld [vmem:[#allocation5 + $0x38] sm:$0xff]  ;;  %v105_v14 = vld [vmem:[#allocation5 + $0x40] sm:$0xff]  ;;  %v106_v15 = vld [vmem:[#allocation5 + $0x48] sm:$0xff]  ;;  %s943_s19 = scalar_lea.vmem %s545_s20, 384  ;;  %p948_p5 = scmp.lt.s32.totalorder %s545_s20, %s545_s20 }
  0x4d   :  { %747 = vmatpush3.bf16.msra.mxu0 %v746_v5  ;;  %v755_v13 = vpack.c.bf16 %v104_v12, %v103_v11  ;;  %v758_v16 = vpack.c.bf16 %v106_v15, %v105_v14  ;;  %v107_v17 = vld [vmem:[#allocation5 + $0x50] sm:$0xff]  ;;  %v108_v18 = vld [vmem:[#allocation5 + $0x58] sm:$0xff]  ;;  %v109_v20 = vld [vmem:[#allocation5 + $0x60] sm:$0xff]  ;;  %p944_p4 = scmp.ne.s32.totalorder %s545_s20, %s943_s19  ;;  %p949_p6 = scmp.lt.s32.totalorder %s943_s19, %s943_s19 }
  0x4e   :  { %748 = vmatprep.subr.bf16.mxu0 %v979_v0  ;;  %v761_v19 = vpack.c.bf16 %v108_v18, %v107_v17  ;;  %v110_v21 = vld [vmem:[#allocation5 + $0x68] sm:$0xff]  ;;  %v111_v23 = vld [vmem:[#allocation5 + $0x70] sm:$0xff]  ;;  %v112_v24 = vld [vmem:[#allocation5 + $0x78] sm:$0xff] }
  0x4f   :  { %v764_v22 = vpack.c.bf16 %v110_v21, %v109_v20  ;;  %v767_v25 = vpack.c.bf16 %v112_v24, %v111_v23  ;;  %v94_v26 = vld [vmem:[#allocation2] sm:$0xff]  ;;  %v95_v27 = vld [vmem:[#allocation2 + $0x8] sm:$0xff]  ;;  %v96_v28 = vld [vmem:[#allocation2 + $0x10] sm:$0xff]  ;;  %p950_p7 = por %p949_p6, %p948_p5 }
  0x50   :  { %v558_v29 = vld [vmem:[%s1241_s2] ss:$0 sm:$0xff]  ;;  %v265_v42 = vld [vmem:[#allocation7] sm:$0xff]  ;;  %v267_v45 = vld [vmem:[#allocation7 + $0x10] sm:$0xff] }
  0x51   :  { %750 = vmatpush3.bf16.msra.mxu0 %v749_v7  ;;  %v266_v43 = vld [vmem:[#allocation7 + $0x8] sm:$0xff]  ;;  %v268_v46 = vld [vmem:[#allocation7 + $0x18] sm:$0xff]  ;;  %v269_v48 = vld [vmem:[#allocation7 + $0x20] sm:$0xff]  ;;  %p951_p8 = pnand %p950_p7, %p944_p4 }
  0x52   :  { %751 = vmatprep.subr.bf16.mxu0 %v979_v0  ;;  %v770_v44 = vpack.c.bf16 %v266_v43, %v265_v42  ;;  %v773_v47 = vpack.c.bf16 %v268_v46, %v267_v45  ;;  %v270_v49 = vld [vmem:[#allocation7 + $0x28] sm:$0xff]  ;;  %v271_v51 = vld [vmem:[#allocation7 + $0x30] sm:$0xff]  ;;  %v272_v52 = vld [vmem:[#allocation7 + $0x38] sm:$0xff] }
  0x53   :  { %v776_v50 = vpack.c.bf16 %v270_v49, %v269_v48  ;;  %v779_v53 = vpack.c.bf16 %v272_v52, %v271_v51  ;;  %v273_v54 = vld [vmem:[#allocation7 + $0x40] sm:$0xff]  ;;  %v274_v55 = vld [vmem:[#allocation7 + $0x48] sm:$0xff]  ;;  %v275_v57 = vld [vmem:[#allocation7 + $0x50] sm:$0xff] }
  0x54   :  { %771 = vmatpush3.bf16.msra.mxu1 %v770_v44  ;;  %v782_v56 = vpack.c.bf16 %v274_v55, %v273_v54  ;;  %v276_v58 = vld [vmem:[#allocation7 + $0x58] sm:$0xff]  ;;  %v277_v60 = vld [vmem:[#allocation7 + $0x60] sm:$0xff]  ;;  %v278_v61 = vld [vmem:[#allocation7 + $0x68] sm:$0xff] }
  0x55   :  { %753 = vmatpush3.bf16.msra.mxu0 %v752_v10  ;;  %772 = vmatprep.subr.bf16.mxu1 %v979_v0  ;;  %v785_v59 = vpack.c.bf16 %v276_v58, %v275_v57  ;;  %v788_v62 = vpack.c.bf16 %v278_v61, %v277_v60  ;;  %v279_v63 = vld [vmem:[#allocation7 + $0x70] sm:$0xff]  ;;  %v280_v2 = vld [vmem:[#allocation7 + $0x78] sm:$0xff]  ;;  %v434_v49 = vld [vmem:[#allocation8 + $0x8] sm:$0xff] }
  0x56   :  { %754 = vmatprep.subr.bf16.mxu0 %v979_v0  ;;  %v791_v3 = vpack.c.bf16 %v280_v2, %v279_v63  ;;  %v435_v2 = vld [vmem:[#allocation8 + $0x10] sm:$0xff] }
  0x58   :  { %774 = vmatpush3.bf16.msra.mxu1 %v773_v47 }
  0x59   :  { %756 = vmatpush3.bf16.msra.mxu0 %v755_v13  ;;  %775 = vmatprep.subr.bf16.mxu1 %v979_v0 }
  0x5a   :  { %757 = vmatprep.subr.bf16.mxu0 %v979_v0 }
  0x5c   :  { %777 = vmatpush3.bf16.msra.mxu1 %v776_v50 }
  0x5d   :  { %759 = vmatpush3.bf16.msra.mxu0 %v758_v16  ;;  %778 = vmatprep.subr.bf16.mxu1 %v979_v0 }
  0x5e   :  { %760 = vmatprep.subr.bf16.mxu0 %v979_v0 }
  0x60   :  { %780 = vmatpush3.bf16.msra.mxu1 %v779_v53  ;;  %v561_v53 = vld [vmem:[%s1245_s6] ss:$0 sm:$0xff] }
  0x61   :  { %762 = vmatpush3.bf16.msra.mxu0 %v761_v19  ;;  %781 = vmatprep.subr.bf16.mxu1 %v979_v0 }
  0x62   :  { %763 = vmatprep.subr.bf16.mxu0 %v979_v0 }
  0x64   :  { %783 = vmatpush3.bf16.msra.mxu1 %v782_v56 }
  0x65   :  { %765 = vmatpush3.bf16.msra.mxu0 %v764_v22  ;;  %784 = vmatprep.subr.bf16.mxu1 %v979_v0 }
  0x66   :  { %766 = vmatprep.subr.bf16.mxu0 %v979_v0 }
  0x68   :  { %786 = vmatpush3.bf16.msra.mxu1 %v785_v59 }
  0x69   :  { %768 = vmatpush3.bf16.msra.mxu0 %v767_v25  ;;  %787 = vmatprep.subr.bf16.mxu1 %v979_v0 }
  0x6a   :  { %793 = vmatprep.subr.bf16.mxu0 %v979_v0 }
  0x6c   :  { %655 = vmatmul.mubr.f32.vlgmr.msra.gmra.mrb[0].mxu0 %v94_v26  ;;  %789 = vmatpush3.bf16.msra.mxu1 %v788_v62 }
  0x6d   :  { %657 = vmatprep.mubr.msk.f32.mxu0 %vm980_vm0, %v981_v1  ;;  %790 = vmatprep.subr.bf16.mxu1 %v979_v0 }
  0x70   :  { %658 = vmatmul.mubr.f32.gmra.mrb[2].mxu0 %v95_v27  ;;  %792 = vmatpush3.bf16.msra.mxu1 %v791_v3  ;;  %v436_v3 = vld [vmem:[#allocation8 + $0x18] sm:$0xff] }
  0x71   :  { %660 = vmatprep.mubr.msk.f32.mxu0 %vm980_vm0, %v981_v1  ;;  %817 = vmatprep.subr.bf16.mxu1 %v979_v0 }
  0x74   :  { %661 = vmatmul.mubr.f32.gmra.mrb[4].mxu0 %v96_v28 }
  0x75   :  { %736 = vmatprep.mubr.msk.f32.mxu0 %vm980_vm0, %v981_v1 }
 0x13f   :  { %v186_v30 = vpop.f32.mrb[0].mxu0 }
 0x140   :  { %v1140_v31 = vadd.f32 %v558_v29, %v186_v30  ;;  %v656_v32 = vpop.f32.mrb[1].mxu0  ;;  %v559_v30 = vld [vmem:[%s1242_s3] ss:$0 sm:$0xff] }
 0x142   :  { %202 = vadd.xlane.f32.xlu0 %v1140_v31  ;;  %v211_v36 = vmul.f32 %v1140_v31, %v1140_v31 }
 0x143   :  { %v191_v33 = vpop.f32.mrb[2].mxu0 }
 0x144   :  { %v1143_v34 = vadd.f32 %v558_v29, %v191_v33  ;;  %v659_v35 = vpop.f32.mrb[3].mxu0  ;;  %v560_v33 = vld [vmem:[%s1243_s4] ss:$0 sm:$0xff] }
 0x146   :  { %214 = vadd.xlane.f32.xlu0 %v211_v36  ;;  %204 = vadd.xlane.f32.xlu1 %v1143_v34  ;;  %v212_v39 = vmul.f32 %v1143_v34, %v1143_v34 }
 0x147   :  { %v196_v37 = vpop.f32.mrb[4].mxu0 }
 0x148   :  { %v1148_v38 = vadd.f32 %v558_v29, %v196_v37  ;;  %v662_v40 = vpop.f32.mrb[5].mxu0 }
 0x14a   :  { %216 = vadd.xlane.f32.xlu1 %v212_v39  ;;  %206 = vadd.xlane.f32.xlu0 %v1148_v38  ;;  %v213_v41 = vmul.f32 %v1148_v38, %v1148_v38 }
 0x14e   :  { %218 = vadd.xlane.f32.xlu1 %v213_v41 }
 0x1cf   :  { %v203_v4 = vpop.xlane.xlu0 %202 }
 0x1d0   :  { %v208_v5 = vmul.f32 0.03125, %v203_v4  ;;  %v797_v4 = vpack.c.bf16 %v436_v3, %v435_v2 }
 0x1d2   :  { %v223_v8 = vmul.f32 %v208_v5, %v208_v5  ;;  %v238_v28 = vsub.f32 %v1140_v31, %v208_v5  ;;  %v437_v5 = vld [vmem:[#allocation8 + $0x20] sm:$0xff] }
 0x1d3   :  { %v215_v6 = vpop.xlane.xlu0 %214  ;;  %v205_v7 = vpop.xlane.xlu1 %204 }
 0x1d4   :  { %v220_v9 = vmul.f32 0.03125, %v215_v6  ;;  %v209_v10 = vmul.f32 0.03125, %v205_v7  ;;  %v438_v6 = vld [vmem:[#allocation8 + $0x28] sm:$0xff] }
 0x1d5   :  { %v800_v7 = vpack.c.bf16 %v438_v6, %v437_v5 }
 0x1d6   :  { %v226_v11 = vsub.f32 %v220_v9, %v223_v8  ;;  %v224_v15 = vmul.f32 %v209_v10, %v209_v10  ;;  %v239_v35 = vsub.f32 %v1143_v34, %v209_v10  ;;  %v439_v8 = vld [vmem:[#allocation8 + $0x30] sm:$0xff]  ;;  %v440_v9 = vld [vmem:[#allocation8 + $0x38] sm:$0xff] }
 0x1d7   :  { %v217_v12 = vpop.xlane.xlu1 %216  ;;  %v207_v13 = vpop.xlane.xlu0 %206  ;;  %v803_v10 = vpack.c.bf16 %v440_v9, %v439_v8 }
 0x1d8   :  { %v229_v14 = vmax.f32 %v226_v11, 0.0  ;;  %v221_v16 = vmul.f32 0.03125, %v217_v12  ;;  %v210_v17 = vmul.f32 0.03125, %v207_v13  ;;  %v441_v11 = vld [vmem:[#allocation8 + $0x40] sm:$0xff]  ;;  %v442_v12 = vld [vmem:[#allocation8 + $0x48] sm:$0xff] }
 0x1d9   :  { %v806_v13 = vpack.c.bf16 %v442_v12, %v441_v11 }
 0x1da   :  { %v232_v18 = vadd.f32 1e-05, %v229_v14  ;;  %v227_v19 = vsub.f32 %v221_v16, %v224_v15  ;;  %v225_v20 = vmul.f32 %v210_v17, %v210_v17  ;;  %v240_v41 = vsub.f32 %v1148_v38, %v210_v17  ;;  %v433_v38 = vld [vmem:[#allocation8] sm:$0xff]  ;;  %v443_v14 = vld [vmem:[#allocation8 + $0x50] sm:$0xff]  ;;  %v444_v15 = vld [vmem:[#allocation8 + $0x58] sm:$0xff] }
 0x1db   :  { %v219_v21 = vpop.xlane.xlu1 %218  ;;  %v794_v50 = vpack.c.bf16 %v434_v49, %v433_v38  ;;  %v809_v16 = vpack.c.bf16 %v444_v15, %v443_v14  ;;  %v445_v17 = vld [vmem:[#allocation8 + $0x60] sm:$0xff]  ;;  %v562_v38 = vld [vmem:[%s1246_s7] ss:$0 sm:$0xff] }
 0x1dc   :  { %843 = vrsqrt.f32 %v232_v18  ;;  %v230_v22 = vmax.f32 %v227_v19, 0.0  ;;  %v222_v23 = vmul.f32 0.03125, %v219_v21  ;;  %v446_v18 = vld [vmem:[#allocation8 + $0x68] sm:$0xff]  ;;  %v448_v21 = vld [vmem:[#allocation8 + $0x78] sm:$0xff] }
 0x1dd   :  { %795 = vmatpush3.bf16.msra.mxu0 %v794_v50  ;;  %v812_v19 = vpack.c.bf16 %v446_v18, %v445_v17 }
 0x1de   :  { %v233_v24 = vadd.f32 1e-05, %v230_v22  ;;  %v228_v25 = vsub.f32 %v222_v23, %v225_v20  ;;  %796 = vmatprep.subr.bf16.mxu0 %v979_v0  ;;  %v447_v20 = vld [vmem:[#allocation8 + $0x70] sm:$0xff] }
 0x1df   :  { %v815_v22 = vpack.c.bf16 %v448_v21, %v447_v20 }
 0x1e0   :  { %845 = vrsqrt.f32 %v233_v24  ;;  %v231_v26 = vmax.f32 %v228_v25, 0.0 }
 0x1e1   :  { %798 = vmatpush3.bf16.msra.mxu0 %v797_v4 }
 0x1e2   :  { %v234_v27 = vadd.f32 1e-05, %v231_v26  ;;  %799 = vmatprep.subr.bf16.mxu0 %v979_v0 }
 0x1e4   :  { %847 = vrsqrt.f32 %v234_v27 }
 0x1e5   :  { %801 = vmatpush3.bf16.msra.mxu0 %v800_v7 }
 0x1e6   :  { %v844_v29 = vpop.eup %843  ;;  %802 = vmatprep.subr.bf16.mxu0 %v979_v0 }
 0x1e7   :  { %v241_v32 = vmul.f32 %v844_v29, %v238_v28 }
 0x1e9   :  { %v250_v36 = vmul.f32 %v559_v30, %v241_v32  ;;  %804 = vmatpush3.bf16.msra.mxu0 %v803_v10 }
 0x1ea   :  { %v846_v37 = vpop.eup %845  ;;  %805 = vmatprep.subr.bf16.mxu0 %v979_v0 }
 0x1eb   :  { %v259_v39 = vadd.f32 %v560_v33, %v250_v36  ;;  %v242_v40 = vmul.f32 %v846_v37, %v239_v35 }
 0x1ed   :  { %v262_v42 = vmax.f32 %v259_v39, 0.0  ;;  %v251_v31 = vmul.f32 %v559_v30, %v242_v40  ;;  %807 = vmatpush3.bf16.msra.mxu0 %v806_v13 }
 0x1ee   :  { %v848_v43 = vpop.eup %847  ;;  %808 = vmatprep.subr.bf16.mxu0 %v979_v0 }
 0x1ef   :  { %696 = vmatmul.mubr.f32.vlgmr.msra.gmra.mrb[0].mxu1 %v262_v42  ;;  %v260_v44 = vadd.f32 %v560_v33, %v251_v31  ;;  %v243_v45 = vmul.f32 %v848_v43, %v240_v41 }
 0x1f0   :  { %698 = vmatprep.mubr.msk.f32.mxu1 %vm980_vm0, %v981_v1  ;;  %825 = vmatpush3.bf16.msra.mxu1 %v794_v50  ;;  %v563_v50 = vld [vmem:[%s1247_s8] ss:$0 sm:$0xff] }
 0x1f1   :  { %v263_v46 = vmax.f32 %v260_v44, 0.0  ;;  %v252_v47 = vmul.f32 %v559_v30, %v243_v45  ;;  %818 = vmatprep.subr.bf16.mxu1 %v979_v0  ;;  %810 = vmatpush3.bf16.msra.mxu0 %v809_v16 }
 0x1f2   :  { %811 = vmatprep.subr.bf16.mxu0 %v979_v0 }
 0x1f3   :  { %699 = vmatmul.mubr.f32.gmra.mrb[2].mxu1 %v263_v46  ;;  %v261_v48 = vadd.f32 %v560_v33, %v252_v47 }
 0x1f4   :  { %701 = vmatprep.mubr.msk.f32.mxu1 %vm980_vm0, %v981_v1  ;;  %826 = vmatpush3.bf16.msra.mxu1 %v797_v4 }
 0x1f5   :  { %v264_v34 = vmax.f32 %v261_v48, 0.0  ;;  %819 = vmatprep.subr.bf16.mxu1 %v979_v0  ;;  %813 = vmatpush3.bf16.msra.mxu0 %v812_v19 }
 0x1f6   :  { %814 = vmatprep.subr.bf16.mxu0 %v979_v0 }
 0x1f7   :  { %702 = vmatmul.mubr.f32.gmra.mrb[4].mxu1 %v264_v34 }
 0x1f8   :  { %739 = vmatprep.mubr.msk.f32.mxu1 %vm980_vm0, %v981_v1  ;;  %827 = vmatpush3.bf16.msra.mxu1 %v800_v7 }
 0x1f9   :  { %820 = vmatprep.subr.bf16.mxu1 %v979_v0  ;;  %816 = vmatpush3.bf16.msra.mxu0 %v815_v22 }
 0x1fc   :  { %828 = vmatpush3.bf16.msra.mxu1 %v803_v10 }
 0x1fd   :  { %821 = vmatprep.subr.bf16.mxu1 %v979_v0 }
 0x200   :  { %829 = vmatpush3.bf16.msra.mxu1 %v806_v13 }
 0x201   :  { %822 = vmatprep.subr.bf16.mxu1 %v979_v0 }
 0x204   :  { %830 = vmatpush3.bf16.msra.mxu1 %v809_v16 }
 0x205   :  { %823 = vmatprep.subr.bf16.mxu1 %v979_v0 }
 0x208   :  { %831 = vmatpush3.bf16.msra.mxu1 %v812_v19 }
 0x209   :  { %824 = vmatprep.subr.bf16.mxu1 %v979_v0 }
 0x20c   :  { %832 = vmatpush3.bf16.msra.mxu1 %v815_v22 }
 0x2c2   :  { %v354_v51 = vpop.f32.mrb[0].mxu1 }
 0x2c3   :  { %v697_v52 = vpop.f32.mrb[1].mxu1  ;;  %v1188_v59 = vadd.f32 %v561_v53, %v354_v51 }
 0x2c5   :  { %v379_v62 = vmul.f32 %v1188_v59, %v1188_v59 }
 0x2c6   :  { %v359_v54 = vpop.f32.mrb[2].mxu1 }
 0x2c7   :  { %v1183_v55 = vadd.f32 %v561_v53, %v359_v54  ;;  %v700_v56 = vpop.f32.mrb[3].mxu1 }
 0x2c9   :  { %372 = vadd.xlane.f32.xlu0 %v1183_v55  ;;  %v380_v57 = vmul.f32 %v1183_v55, %v1183_v55 }
 0x2ca   :  { %v364_v58 = vpop.f32.mrb[4].mxu1 }
 0x2cb   :  { %384 = vadd.xlane.f32.xlu1 %v380_v57  ;;  %v703_v60 = vpop.f32.mrb[5].mxu1  ;;  %v1190_v61 = vadd.f32 %v561_v53, %v364_v58 }
 0x2cd   :  { %370 = vadd.xlane.f32.xlu0 %v1188_v59  ;;  %v381_v63 = vmul.f32 %v1190_v61, %v1190_v61 }
 0x2cf   :  { %374 = vadd.xlane.f32.xlu1 %v1190_v61 }
 0x2d1   :  { %382 = vadd.xlane.f32.xlu0 %v379_v62 }
 0x2d3   :  { %386 = vadd.xlane.f32.xlu1 %v381_v63 }
 0x356   :  { %v373_v23 = vpop.xlane.xlu0 %372 }
 0x357   :  { %v377_v24 = vmul.f32 0.03125, %v373_v23 }
 0x358   :  { %v385_v25 = vpop.xlane.xlu1 %384 }
 0x359   :  { %v392_v26 = vmul.f32 %v377_v24, %v377_v24  ;;  %v389_v27 = vmul.f32 0.03125, %v385_v25  ;;  %v407_v48 = vsub.f32 %v1183_v55, %v377_v24 }
 0x35a   :  { %v371_v28 = vpop.xlane.xlu0 %370 }
 0x35b   :  { %v395_v29 = vsub.f32 %v389_v27, %v392_v26  ;;  %v376_v30 = vmul.f32 0.03125, %v371_v28 }
 0x35c   :  { %v375_v32 = vpop.xlane.xlu1 %374 }
 0x35d   :  { %v398_v33 = vmax.f32 %v395_v29, 0.0  ;;  %v378_v35 = vmul.f32 0.03125, %v375_v32  ;;  %v391_v39 = vmul.f32 %v376_v30, %v376_v30  ;;  %v406_v52 = vsub.f32 %v1188_v59, %v376_v30  ;;  %v564_v59 = vld [vmem:[%s1249_s10] ss:$0 sm:$0xff] }
 0x35e   :  { %v383_v36 = vpop.xlane.xlu0 %382 }
 0x35f   :  { %v401_v37 = vadd.f32 1e-05, %v398_v33  ;;  %v388_v40 = vmul.f32 0.03125, %v383_v36  ;;  %v393_v0 = vmul.f32 %v378_v35, %v378_v35  ;;  %v408_v56 = vsub.f32 %v1190_v61, %v378_v35 }
 0x360   :  { %v387_v41 = vpop.xlane.xlu1 %386 }
 0x361   :  { %849 = vrsqrt.f32 %v401_v37  ;;  %v394_v42 = vsub.f32 %v388_v40, %v391_v39  ;;  %v390_v31 = vmul.f32 0.03125, %v387_v41 }
 0x363   :  { %v397_v43 = vmax.f32 %v394_v42, 0.0  ;;  %v396_v44 = vsub.f32 %v390_v31, %v393_v0 }
 0x365   :  { %v400_v45 = vadd.f32 1e-05, %v397_v43  ;;  %v399_v46 = vmax.f32 %v396_v44, 0.0 }
 0x367   :  { %851 = vrsqrt.f32 %v400_v45  ;;  %v402_v47 = vadd.f32 1e-05, %v399_v46 }
 0x369   :  { %853 = vrsqrt.f32 %v402_v47 }
 0x36b   :  { %v850_v34 = vpop.eup %849 }
 0x36c   :  { %v410_v49 = vmul.f32 %v850_v34, %v407_v48 }
 0x36e   :  { %v419_v51 = vmul.f32 %v562_v38, %v410_v49 }
 0x370   :  { %v428_v53 = vadd.f32 %v563_v50, %v419_v51 }
 0x371   :  { %v852_v54 = vpop.eup %851 }
 0x372   :  { %v409_v57 = vmul.f32 %v852_v54, %v406_v52  ;;  %v431_v58 = vmax.f32 %v428_v53, 0.0 }
 0x373   :  { %v854_v55 = vpop.eup %853 }
 0x374   :  { %740 = vmatmul.mubr.f32.vlgmr.msra.gmra.mrb[6].mxu1 %v431_v58  ;;  %v418_v60 = vmul.f32 %v562_v38, %v409_v57  ;;  %v411_v62 = vmul.f32 %v854_v55, %v408_v56 }
 0x375   :  { %742 = vmatprep.mubr.msk.f32.mxu1 %vm980_vm0, %v981_v1 }
 0x376   :  { %v427_v63 = vadd.f32 %v563_v50, %v418_v60  ;;  %v420_v2 = vmul.f32 %v562_v38, %v411_v62 }
 0x378   :  { %v430_v3 = vmax.f32 %v427_v63, 0.0  ;;  %v429_v4 = vadd.f32 %v563_v50, %v420_v2 }
 0x37a   :  { %737 = vmatmul.mubr.f32.vlgmr.msra.gmra.mrb[6].mxu0 %v430_v3  ;;  %v432_v5 = vmax.f32 %v429_v4, 0.0 }
 0x37c   :  { %743 = vmatmul.mubr.f32.gmra.mrb[8].mxu1 %v432_v5 }
 0x447   :  { %v527_v61 = vpop.f32.mrb[6].mxu1 }
 0x448   :  { %v528_v6 = vadd.f32 %v564_v59, %v527_v61  ;;  %v741_v7 = vpop.f32.mrb[7].mxu1 }
 0x44a   :  { %537 = vst [vmem:[#allocation10 + $0x8] sm:$0xff] %v528_v6 }
 0x44d   :  { %v522_v8 = vpop.f32.mrb[6].mxu0 }
 0x44e   :  { %v523_v9 = vadd.f32 %v564_v59, %v522_v8  ;;  %v738_v1 = vpop.f32.mrb[7].mxu0 }
 0x44f   :  { %v532_v10 = vpop.f32.mrb[8].mxu1 }
 0x450   :  { %536 = vst [vmem:[#allocation10] sm:$0xff] %v523_v9  ;;  %v533_v11 = vadd.f32 %v564_v59, %v532_v10  ;;  %v744_v12 = vpop.f32.mrb[9].mxu1 }
 0x452   :  { %538 = vst [vmem:[#allocation10 + $0x10] sm:$0xff] %v533_v11 }
 0x453   :  { %954 = shalt.err (!%p951_p8)
}
 0x454   :  { %s955_s22 = scalar_lea.hbm %s1250_s11, 384 }
 0x455   :  { %p956_p9 = scmp.ne.s32.totalorder %s1250_s11, %s955_s22  ;;  %p959_p10 = scmp.lt.u32.totalorder %s955_s22, %s1250_s11 }
 0x457   :  { %p961_p11 = pnand %p959_p10, %p956_p9 }
 0x459   :  { %964 = shalt.err (!%p961_p11)
}
 0x45a   :  { %550 = dma.vmem_to_hbm [thread:$0]  %s545_s20, 384, %s1250_s11, [#allocation4], %s975_s29, %s975_s29, %s976_s30  }
 0x45b   :  { %971 = dma.done.wait [#allocation4], 384  }
 0x45c   :  { %972 = vsyncadd [#allocation4], 4294966912 }
 0x45d   :  { %554 = vsyncpa [#allocation3], 1 }
 0x45e   :  { %555 = vsyncpa [#allocation6], 1 }
 0x45f   :  { %556 = vsyncpa [#allocation9], 1 }
 0x460   :  { %557 = vsyncpa [#allocation4], 1 }

</bundles_post_ra>
